<compile_context>
chip_gen: v7x
topology: tpu7x:2x2x1
jax: 0.10.0
libtpu: 0.0.40
codegen_flags: <defaults>
</compile_context>

<pallas_src>
import jax
import jax.numpy as jnp
from jax.experimental import pallas as pl
from jax.experimental.pallas import tpu as pltpu


def _round_up(x, m):
    return ((x + m - 1) // m) * m


def _linear_kernel(x_ref, w_ref, b_ref, o_ref):
    # x_ref: (TM, K) bf16   w_ref: (K, NP) bf16   b_ref: (1, NP) f32
    # o_ref: (TM, NP) f32
    acc = jnp.dot(x_ref[...], w_ref[...], preferred_element_type=jnp.float32)
    o_ref[...] = (acc + b_ref[...]).astype(o_ref.dtype)


def sequence_tagger_linear(sentence_tensor, weight, bias, *, tm=None):
    """SequenceTagger output projection (nn.Linear) as a Pallas kernel.

    sentence_tensor: (B, S, 2H)  encoder output (bf16 preferred; f32 is cast)
    weight:          (num_labels, 2H)  -- PyTorch nn.Linear layout
    bias:            (num_labels,)
    returns:         (B, S, num_labels) float32
    """
    B, S, K = sentence_tensor.shape
    N = weight.shape[0]
    M = B * S

    # ---- bf16 compute inputs (f32 accumulation inside the kernel). ----
    x2d = sentence_tensor.reshape(M, K)
    if x2d.dtype != jnp.bfloat16:
        # TODO(synk): ideally the encoder emits bf16 directly so this cast
        # pass over the activations is unnecessary.
        x2d = x2d.astype(jnp.bfloat16)
    in_itemsize = 2   # bf16
    out_itemsize = 4  # f32 output (matches the module's f32 features)

    # ---- Shape-conditional output width. ----
    # Small K: padded 128-wide f32 writeback would dominate HBM traffic ->
    # write the true N columns (full-dim block is always legal).
    # Large K: keep lane-dense NP (multiple of 128) for unmasked stores.
    small_k = K <= max(512, 8 * N)
    NP = N if small_k else max(128, _round_up(N, 128))

    # One-off tiny prep (outside the hot grid loop): transpose weight to
    # matmul layout (K, NP) in bf16; bias stays f32 (added post-accumulation).
    w_p = weight.astype(jnp.bfloat16).T          # (K, N)
    b_p = bias.astype(jnp.float32).reshape(1, N)  # (1, N)
    if NP != N:
        w_p = jnp.pad(w_p, ((0, 0), (0, NP - N)))
        b_p = jnp.pad(b_p, ((0, 0), (0, NP - N)))

    # ---- Generation-aware tile / VMEM budgeting. ----
    try:
        vmem_cap = int(pltpu.get_tpu_info().vmem_capacity_bytes)
    except Exception:
        vmem_cap = 64 << 20  # conservative (v7x per-TC)

    # Per-buffer budget ~VMEM/5: ~12 MiB on 64 MiB parts, ~25 MiB on 128 MiB.
    buf_budget = min(vmem_cap // 5, 28 << 20)
    # Cap accounts for BOTH the X tile and the output tile per row.
    row_bytes = K * in_itemsize + NP * out_itemsize
    tm_cap = max(16, (buf_budget // row_bytes) // 16 * 16)
    if tm is not None:
        tm_cap = min(tm_cap, max(16, (tm // 16) * 16))

    if M <= tm_cap:
        tm_eff = M            # single block: full-dim block is always legal
    else:
        tm_eff = tm_cap       # multiple of 16 (bf16 sublane tile)
    grid_m = pl.cdiv(M, tm_eff)   # ragged last block handled by Pallas

    # VMEM: double-buffered X + out tiles, resident W (conservatively x2) + bias.
    vmem_bytes = (
        2 * tm_eff * K * in_itemsize
        + 2 * tm_eff * NP * out_itemsize
        + 2 * K * NP * in_itemsize
        + 2 * NP * out_itemsize
    )
    vmem_ceiling = (48 << 20) if vmem_cap <= (64 << 20) else (96 << 20)
    vmem_limit = min(max(int(vmem_bytes * 1.25), 2 << 20), vmem_ceiling)

    cost = pl.CostEstimate(
        flops=2 * M * K * NP,
        transcendentals=0,
        bytes_accessed=(M * K * in_itemsize
                        + K * NP * in_itemsize
                        + M * NP * out_itemsize),
    )

    out2d = pl.pallas_call(
        _linear_kernel,
        out_shape=jax.ShapeDtypeStruct((M, NP), jnp.float32),
        grid=(grid_m,),
        in_specs=[
            pl.BlockSpec((tm_eff, K), lambda i: (i, 0)),   # stream X tiles
            pl.BlockSpec((K, NP), lambda i: (0, 0)),       # resident weight
            pl.BlockSpec((1, NP), lambda i: (0, 0)),       # resident bias
        ],
        out_specs=pl.BlockSpec((tm_eff, NP), lambda i: (i, 0)),
        compiler_params=pltpu.CompilerParams(
            # Independent M tiles -> parallel grid (dual-TC shard on v7x).
            dimension_semantics=("parallel",),
            vmem_limit_bytes=vmem_limit,
        ),
        cost_estimate=cost,
    )(x2d, w_p, b_p)

    out2d = out2d if NP == N else out2d[:, :N]
    return out2d.reshape(B, S, N)


def reference_linear(sentence_tensor, weight, bias):
    # f32 reference with the same bf16-quantized operands the kernel consumes.
    x = sentence_tensor.astype(jnp.bfloat16).astype(jnp.float32)
    w = weight.astype(jnp.bfloat16).astype(jnp.float32)
    return jnp.einsum("bsk,nk->bsn", x, w) + bias.astype(jnp.float32)


if __name__ == "__main__":
    # Shapes implied by the module: options['hidden_size'], options['num_labels']
    batch, seq = 2, 8
    hidden_size = 32          # encoder hidden -> linear in_features = 2*hidden
    num_labels = 8

    key = jax.random.PRNGKey(0)
    k_x, k_w, k_b = jax.random.split(key, 3)

    # Deterministic stand-in for the (unavailable) Encoder output, in bf16.
    sentence_tensor = jax.random.normal(
        k_x, (batch, seq, 2 * hidden_size), dtype=jnp.float32
    ).astype(jnp.bfloat16)

    # Deterministic nn.Linear(hidden_size*2, num_labels) parameters.
    bound = 1.0 / jnp.sqrt(2.0 * hidden_size)
    weight = jax.random.uniform(
        k_w, (num_labels, 2 * hidden_size), minval=-bound, maxval=bound,
        dtype=jnp.float32,
    )
    bias = jax.random.uniform(
        k_b, (num_labels,), minval=-bound, maxval=bound, dtype=jnp.float32
    )

    features = sequence_tagger_linear(sentence_tensor, weight, bias)
    features = jax.block_until_ready(features)

    # Mirror the module's NaN assertion and check against a pure-JAX reference.
    assert not bool(jnp.isnan(features).any())
    ref = reference_linear(sentence_tensor, weight, bias)
    assert bool(jnp.allclose(features, ref, atol=2e-2, rtol=2e-2))

    print("KERNEL_OK")
</pallas_src>

<mosaic_0001>
module attributes {stable_mosaic.version = 11 : i64} {
  func.func @_linear_kernel(%arg0: i32, %arg1: memref<16x64xbf16, #tpu.memory_space<vmem>>, %arg2: memref<64x8xbf16, #tpu.memory_space<vmem>>, %arg3: memref<1x8xf32, #tpu.memory_space<vmem>>, %arg4: memref<16x8xf32, #tpu.memory_space<vmem>>) attributes {dimension_semantics = [#tpu.dimension_semantics<parallel>], iteration_bounds = array<i64: 1>, scalar_prefetch = 0 : i64, scratch_operands = 0 : i64, tpu.core_type = #tpu.core_type<tc>, window_params = [{transform_indices = @transform_0, window_bounds = array<i64: 16, 64>}, {pipeline_mode = #tpu.pipeline_mode<synchronous>, transform_indices = @transform_1, window_bounds = array<i64: 64, 8>}, {pipeline_mode = #tpu.pipeline_mode<synchronous>, transform_indices = @transform_2, window_bounds = array<i64: 1, 8>}, {transform_indices = @transform_3, window_bounds = array<i64: 16, 8>}]} {
    %c0 = arith.constant 0 : index
    %c0_0 = arith.constant 0 : index
    %0 = vector.load %arg1[%c0, %c0_0] : memref<16x64xbf16, #tpu.memory_space<vmem>>, vector<16x64xbf16>
    %c0_1 = arith.constant 0 : index
    %c0_2 = arith.constant 0 : index
    %1 = vector.load %arg2[%c0_1, %c0_2] : memref<64x8xbf16, #tpu.memory_space<vmem>>, vector<64x8xbf16>
    %cst = arith.constant dense<0.000000e+00> : vector<16x8xf32>
    %2 = tpu.matmul %0, %1, %cst {dimension_numbers = #tpu.dot_dimension_numbers<[1], [0], [0], [1], [0, 0, 1, 1], [], []>} : vector<16x64xbf16>, vector<64x8xbf16>, vector<16x8xf32> -> vector<16x8xf32>
    %c0_3 = arith.constant 0 : index
    %c0_4 = arith.constant 0 : index
    %3 = vector.load %arg3[%c0_3, %c0_4] : memref<1x8xf32, #tpu.memory_space<vmem>>, vector<1x8xf32>
    %4 = vector.broadcast %3 : vector<1x8xf32> to vector<16x8xf32>
    %5 = arith.addf %2, %4 : vector<16x8xf32>
    %c0_5 = arith.constant 0 : index
    %c0_6 = arith.constant 0 : index
    %6 = vector.load %arg4[%c0_5, %c0_6] : memref<16x8xf32, #tpu.memory_space<vmem>>, vector<16x8xf32>
    tpu.vector_store %arg4[%c0_5, %c0_6], %5 {strides = array<i32>} : memref<16x8xf32, #tpu.memory_space<vmem>>, vector<16x8xf32>,
    return
  }
  func.func @transform_0(%arg0: i32) -> (i32, i32) {
    %c0_i32 = arith.constant 0 : i32
    %c0_i32_0 = arith.constant 0 : i32
    return %arg0, %c0_i32 : i32, i32
  }
  func.func @transform_1(%arg0: i32) -> (i32, i32) {
    %c0_i32 = arith.constant 0 : i32
    %c0_i32_0 = arith.constant 0 : i32
    %c0_i32_1 = arith.constant 0 : i32
    return %c0_i32, %c0_i32_0 : i32, i32
  }
  func.func @transform_2(%arg0: i32) -> (i32, i32) {
    %c0_i32 = arith.constant 0 : i32
    %c0_i32_0 = arith.constant 0 : i32
    %c0_i32_1 = arith.constant 0 : i32
    return %c0_i32, %c0_i32_0 : i32, i32
  }
  func.func @transform_3(%arg0: i32) -> (i32, i32) {
    %c0_i32 = arith.constant 0 : i32
    %c0_i32_0 = arith.constant 0 : i32
    return %arg0, %c0_i32 : i32, i32
  }
}

</mosaic_0001>

<bundles_post_ra>
// kernel: tpu_custom_call.1
= control target key start
LH: loop header
LB: loop body
LE: loop exit
PB: predicated region body
PF: predicated region fallthrough
CT: control target
= control target key end

     0   :  { %v144_v0 = vmov 0.0   ;;  %vm145_vm0 = vmmov 0   ;;  %vm61_vm1 = vcmask 523264   ;;  %vm106_vm2 = vcmask 64512   ;;  %s190_s1 = inlined_call_operand.vmem [shape: bf16[64,8], index: 1, kind: input, shape index: {}]   ;;  %s191_s0 = inlined_call_operand.vmem [shape: bf16[16,64], index: 0, kind: input, shape index: {}]   ;;  %s192_s2 = inlined_call_operand.vmem [shape: f32[1,8], index: 2, kind: input, shape index: {}]   ;;  %s193_s3 = inlined_call_operand.vmem [shape: f32[16,8], index: 3, kind: output, shape index: {}]  }
   0x1   :  { %125 = vmatprep.subr.bf16.mxu0 %v144_v0  ;;  %v139_v1 = vld [vmem:[%s190_s1] sm:$0xff]   ;;  %133 = vmatprep.mubr.msk.bf16.mxu0 %vm145_vm0, %v144_v0  ;;  %v140_v2 = vld [vmem:[%s190_s1 + $0x8] sm:$0xff]   ;;  %v141_v3 = vld [vmem:[%s190_s1 + $0x10] sm:$0xff]  }
   0x2   :  { %126 = vmatpush3.bf16.msra.mxu0 %v139_v1  ;;  %v142_v4 = vld [vmem:[%s190_s1 + $0x18] sm:$0xff]   ;;  %v143_v5 = vld [vmem:[%s191_s0] sm:$0xff]  }
   0x3   :  { %127 = vmatprep.subr.bf16.mxu0 %v144_v0  ;;  %v113_v6 = vld [vmem:[%s192_s2] ss:$0 sm:$0xff] }
   0x6   :  { %128 = vmatpush3.bf16.msra.mxu0 %v140_v2 }
   0x7   :  { %129 = vmatprep.subr.bf16.mxu0 %v144_v0 }
   0xa   :  { %130 = vmatpush3.bf16.msra.mxu0 %v141_v3 }
   0xb   :  { %131 = vmatprep.subr.bf16.mxu0 %v144_v0 }
   0xe   :  { %132 = vmatpush3.bf16.msra.mxu0 %v142_v4 }
  0x11   :  { %134 = vmatmul.mubr.msk.bf16.vlgmr.msra.gmra.mrb[0].mxu0 %vm61_vm1, %v143_v5 }
  0xe4   :  { %v99_v7 = vpop.f32.mrb[0].mxu0 }
  0xe5   :  { %v100_v8 = vadd.f32 %v113_v6, %v99_v7  ;;  %v135_v9 = vpop.f32.mrb[1].mxu0 }
  0xe6   :  { %v102_v10 = vpop.f32.mrb[2].mxu0 }
  0xe7   :  { %107 = vst.msk [vmem:[%s193_s3] sm:$0xff] %vm106_vm2, %v100_v8  ;;  %v103_v11 = vadd.f32 %v113_v6, %v102_v10  ;;  %v136_v12 = vpop.f32.mrb[3].mxu0 }
  0xe9   :  { %108 = vst.msk [vmem:[%s193_s3 + $0x8] sm:$0xff] %vm106_vm2, %v103_v11 }

</bundles_post_ra>
